<compile_context>
chip_gen: v5e
topology: v5e:2x2
jax: 0.10.0
libtpu: 0.0.40
codegen_flags: <defaults>
</compile_context>

<pallas_src>
import jax
import jax.numpy as jnp
from jax.experimental import pallas as pl
from jax.experimental.pallas import tpu as pltpu


def policy_kernel(obs_ref, w1_ref, b1_ref, w2_ref, b2_ref, w3_ref, b3_ref, o_ref):
    """Batch lives on the lane (last) axis; activations are (H, Bt).

    obs_ref: (N, Bt) int32
    w1_ref : (H1, 3N) f32, class-major columns: col k*N + i  <->  W1[3*i + k, :]
    b1_ref : (H1, 1)
    w2_ref : (H2, H1)     b2_ref: (H2, 1)
    w3_ref : (n_out, H2)  b3_ref: (n_out, 1)
    o_ref  : (n_out, Bt)
    """
    obs = obs_ref[...]                                    # (N, Bt) int32 in VMEM

    # One-hot folded into a single class-major mask block (one MXU push).
    hots = jnp.concatenate(
        [(obs == 0).astype(jnp.float32),
         (obs == 1).astype(jnp.float32),
         (obs == 2).astype(jnp.float32)], axis=0)         # (3N, Bt)

    # ---- Layer 1: Linear + ReLU ------------------------------------------
    h1 = jnp.dot(w1_ref[...], hots, preferred_element_type=jnp.float32)
    h1 = jnp.maximum(h1 + b1_ref[...], 0.0)               # (H1, Bt)

    # ---- Layer 2: Linear + ReLU ------------------------------------------
    h2 = jnp.dot(w2_ref[...], h1, preferred_element_type=jnp.float32)
    h2 = jnp.maximum(h2 + b2_ref[...], 0.0)               # (H2, Bt)

    # ---- Output layer: Linear + Identity ----------------------------------
    out = jnp.dot(w3_ref[...], h2, preferred_element_type=jnp.float32)
    o_ref[...] = (out + b3_ref[...]).astype(o_ref.dtype)  # (n_out, Bt), lane-dense


def _cdiv(a, b):
    return -(-a // b)


def _round_up(a, m):
    return _cdiv(a, m) * m


def policy_forward(obs_int, params, block_b=1024):
    """obs_int: int32 array, shape (N,) (module semantics) or (B, N) batched.

    Returns (1, n_out) for a single observation, (B, n_out) for a batch.
    """
    w1, b1, w2, b2, w3, b3 = params
    obs = jnp.asarray(obs_int, jnp.int32)

    if obs.ndim == 1:
        # Single observation (the module's exact forward). A 240-parameter MLP:
        # plain XLA beats kernel launch + tile padding, so bypass pallas_call.
        n = obs.shape[0]
        hots = jax.nn.one_hot(obs, 3, dtype=jnp.float32).reshape(1, 3 * n)
        h = jnp.maximum(hots @ w1 + b1, 0.0)
        h = jnp.maximum(h @ w2 + b2, 0.0)
        return h @ w3 + b3

    B, N = obs.shape
    H1, H2, n_out = w1.shape[1], w2.shape[1], w3.shape[1]

    # ---- weight prep: class-major reorder + transpose (tiny one-time XLA) --
    # w1t[h, k*N + i] == w1[3*i + k, h]  -> matches the in-kernel concat order.
    w1t = w1.reshape(N, 3, H1).transpose(1, 0, 2).reshape(3 * N, H1).T  # (H1, 3N)
    b1t = b1.reshape(H1, 1)
    w2t = w2.T                                                           # (H2, H1)
    b2t = b2.reshape(H2, 1)
    w3t = w3.T                                                           # (n_out, H2)
    b3t = b3.reshape(n_out, 1)

    # ---- batch tiling: batch on the lane axis, tiles multiples of 128 ------
    Bl = _round_up(B, 128)                 # lane-aligned batch
    nblk = max(1, _cdiv(Bl, block_b))
    if nblk < 2 and Bl >= 256:
        nblk = 2                           # >=2 parallel steps (v7x two TCs)
    bt = _round_up(_cdiv(Bl, nblk), 128)
    Bp = bt * _cdiv(Bl, bt)

    obs_t = obs.T                          # (N, B): batch -> lanes
    if Bp != B:
        # Pad tail tile only when B isn't tile-aligned (demo uses B % bt == 0).
        # TODO(synk): ragged tail via a second small call to avoid this copy.
        obs_t = jnp.pad(obs_t, ((0, 0), (0, Bp - B)))

    cost = pl.CostEstimate(
        flops=2 * B * (3 * N * H1 + H1 * H2 + H2 * n_out),
        transcendentals=0,
        bytes_accessed=4 * (B * (N + n_out)
                            + 3 * N * H1 + H1 * H2 + H2 * n_out
                            + H1 + H2 + n_out),
    )

    out_t = pl.pallas_call(
        policy_kernel,
        out_shape=jax.ShapeDtypeStruct((n_out, Bp), jnp.float32),
        grid=(Bp // bt,),
        in_specs=[
            # Observations: one lane-dense tile of batch columns per grid step.
            pl.BlockSpec((N, bt), lambda i: (0, i)),
            # Weights / biases: constant index_map -> VMEM-resident, no re-DMA.
            pl.BlockSpec((H1, 3 * N), lambda i: (0, 0)),
            pl.BlockSpec((H1, 1), lambda i: (0, 0)),
            pl.BlockSpec((H2, H1), lambda i: (0, 0)),
            pl.BlockSpec((H2, 1), lambda i: (0, 0)),
            pl.BlockSpec((n_out, H2), lambda i: (0, 0)),
            pl.BlockSpec((n_out, 1), lambda i: (0, 0)),
        ],
        out_specs=pl.BlockSpec((n_out, bt), lambda i: (0, i)),
        compiler_params=pltpu.CompilerParams(
            dimension_semantics=("parallel",)),   # batch axis across v7x TCs
        cost_estimate=cost,
    )(obs_t, w1t, b1t, w2t, b2t, w3t, b3t)

    return out_t[:, :B].T                  # (B, n_out)


def init_params(key, in_dim, hiddens, out_dim):
    """PyTorch-default-style uniform(-1/sqrt(fan_in), 1/sqrt(fan_in)) init.
    Weights stored as (in, out) so the reference forward is x @ W + b."""
    sizes = [in_dim] + hiddens + [out_dim]
    params = []
    for j in range(len(sizes) - 1):
        key, kw, kb = jax.random.split(key, 3)
        bound = 1.0 / jnp.sqrt(sizes[j])
        w = jax.random.uniform(kw, (sizes[j], sizes[j + 1]), jnp.float32,
                               minval=-bound, maxval=bound)
        b = jax.random.uniform(kb, (1, sizes[j + 1]), jnp.float32,
                               minval=-bound, maxval=bound)
        params += [w, b]
    return tuple(params)


if __name__ == "__main__":
    key = jax.random.PRNGKey(0)

    # Shapes consistent with the module:
    #   observation length N=8  ->  one-hot flattened input dim 3*N = 24
    #   hiddens = [8, 4], output action count n_out = 4
    N = 8
    hiddens = [8, 4]
    n_out = 4
    B = 256  # batched rollout evaluation; single-obs path checked below too

    key, k_obs, k_par = jax.random.split(key, 3)
    obs_batch = jax.random.randint(k_obs, (B, N), 0, 3, dtype=jnp.int32)
    params = init_params(k_par, 3 * N, hiddens, n_out)

    out = policy_forward(obs_batch, params)
    jax.block_until_ready(out)

    # Reference in plain JAX (same math as the nn.Sequential forward).
    w1, b1, w2, b2, w3, b3 = params
    hots = jax.nn.one_hot(obs_batch, 3, dtype=jnp.float32).reshape(B, -1)
    ref = jnp.maximum(hots @ w1 + b1, 0.0)
    ref = jnp.maximum(ref @ w2 + b2, 0.0)
    ref = ref @ w3 + b3
    assert out.shape == (B, n_out)
    assert jnp.allclose(out, ref, atol=1e-5), "batched mismatch vs reference"

    # Single-observation path (exact module semantics: output shape (1, n_out)).
    single = policy_forward(obs_batch[0], params)
    jax.block_until_ready(single)
    assert single.shape == (1, n_out)
    assert jnp.allclose(single, ref[:1], atol=1e-5), "single-obs mismatch vs reference"

    print("KERNEL_OK")
</pallas_src>

<mosaic_0001>
module attributes {stable_mosaic.version = 11 : i64} {
  func.func @policy_kernel(%arg0: i32, %arg1: memref<8x128xi32, #tpu.memory_space<vmem>>, %arg2: memref<8x24xf32, #tpu.memory_space<vmem>>, %arg3: memref<8x1xf32, #tpu.memory_space<vmem>>, %arg4: memref<4x8xf32, #tpu.memory_space<vmem>>, %arg5: memref<4x1xf32, #tpu.memory_space<vmem>>, %arg6: memref<4x4xf32, #tpu.memory_space<vmem>>, %arg7: memref<4x1xf32, #tpu.memory_space<vmem>>, %arg8: memref<4x128xf32, #tpu.memory_space<vmem>>) attributes {dimension_semantics = [#tpu.dimension_semantics<parallel>], iteration_bounds = array<i64: 2>, scalar_prefetch = 0 : i64, scratch_operands = 0 : i64, tpu.core_type = #tpu.core_type<tc>, window_params = [{transform_indices = @transform_0, window_bounds = array<i64: 8, 128>}, {pipeline_mode = #tpu.pipeline_mode<synchronous>, transform_indices = @transform_1, window_bounds = array<i64: 8, 24>}, {pipeline_mode = #tpu.pipeline_mode<synchronous>, transform_indices = @transform_2, window_bounds = array<i64: 8, 1>}, {pipeline_mode = #tpu.pipeline_mode<synchronous>, transform_indices = @transform_3, window_bounds = array<i64: 4, 8>}, {pipeline_mode = #tpu.pipeline_mode<synchronous>, transform_indices = @transform_4, window_bounds = array<i64: 4, 1>}, {pipeline_mode = #tpu.pipeline_mode<synchronous>, transform_indices = @transform_5, window_bounds = array<i64: 4, 4>}, {pipeline_mode = #tpu.pipeline_mode<synchronous>, transform_indices = @transform_6, window_bounds = array<i64: 4, 1>}, {transform_indices = @transform_7, window_bounds = array<i64: 4, 128>}]} {
    %c0 = arith.constant 0 : index
    %c0_0 = arith.constant 0 : index
    %0 = vector.load %arg1[%c0, %c0_0] : memref<8x128xi32, #tpu.memory_space<vmem>>, vector<8x128xi32>
    %c0_i32 = arith.constant 0 : i32
    %1 = vector.broadcast %c0_i32 : i32 to vector<8x128xi32>
    %2 = arith.cmpi eq, %0, %1 : vector<8x128xi32>
    %3 = arith.extui %2 : vector<8x128xi1> to vector<8x128xi32>
    %4 = arith.sitofp %3 : vector<8x128xi32> to vector<8x128xf32>
    %c1_i32 = arith.constant 1 : i32
    %5 = vector.broadcast %c1_i32 : i32 to vector<8x128xi32>
    %6 = arith.cmpi eq, %0, %5 : vector<8x128xi32>
    %7 = arith.extui %6 : vector<8x128xi1> to vector<8x128xi32>
    %8 = arith.sitofp %7 : vector<8x128xi32> to vector<8x128xf32>
    %c2_i32 = arith.constant 2 : i32
    %9 = vector.broadcast %c2_i32 : i32 to vector<8x128xi32>
    %10 = arith.cmpi eq, %0, %9 : vector<8x128xi32>
    %11 = arith.extui %10 : vector<8x128xi1> to vector<8x128xi32>
    %12 = arith.sitofp %11 : vector<8x128xi32> to vector<8x128xf32>
    %13 = tpu.concatenate %4, %8, %12 in 0 : vector<8x128xf32>, vector<8x128xf32>, vector<8x128xf32> -> vector<24x128xf32>
    %c0_1 = arith.constant 0 : index
    %c0_2 = arith.constant 0 : index
    %14 = vector.load %arg2[%c0_1, %c0_2] : memref<8x24xf32, #tpu.memory_space<vmem>>, vector<8x24xf32>
    %cst = arith.constant dense<0.000000e+00> : vector<8x128xf32>
    %15 = tpu.matmul %14, %13, %cst {dimension_numbers = #tpu.dot_dimension_numbers<[1], [0], [0], [1], [0, 0, 1, 1], [], []>} : vector<8x24xf32>, vector<24x128xf32>, vector<8x128xf32> -> vector<8x128xf32>
    %c0_3 = arith.constant 0 : index
    %c0_4 = arith.constant 0 : index
    %16 = vector.load %arg3[%c0_3, %c0_4] : memref<8x1xf32, #tpu.memory_space<vmem>>, vector<8x1xf32>
    %17 = vector.broadcast %16 : vector<8x1xf32> to vector<8x128xf32>
    %18 = arith.addf %15, %17 : vector<8x128xf32>
    %cst_5 = arith.constant 0.000000e+00 : f32
    %19 = vector.broadcast %cst_5 : f32 to vector<8x128xf32>
    %20 = arith.maximumf %18, %19 : vector<8x128xf32>
    %c0_6 = arith.constant 0 : index
    %c0_7 = arith.constant 0 : index
    %21 = vector.load %arg4[%c0_6, %c0_7] : memref<4x8xf32, #tpu.memory_space<vmem>>, vector<4x8xf32>
    %cst_8 = arith.constant dense<0.000000e+00> : vector<4x128xf32>
    %22 = tpu.matmul %21, %20, %cst_8 {dimension_numbers = #tpu.dot_dimension_numbers<[1], [0], [0], [1], [0, 0, 1, 1], [], []>} : vector<4x8xf32>, vector<8x128xf32>, vector<4x128xf32> -> vector<4x128xf32>
    %c0_9 = arith.constant 0 : index
    %c0_10 = arith.constant 0 : index
    %23 = vector.load %arg5[%c0_9, %c0_10] : memref<4x1xf32, #tpu.memory_space<vmem>>, vector<4x1xf32>
    %24 = vector.broadcast %23 : vector<4x1xf32> to vector<4x128xf32>
    %25 = arith.addf %22, %24 : vector<4x128xf32>
    %cst_11 = arith.constant 0.000000e+00 : f32
    %26 = vector.broadcast %cst_11 : f32 to vector<4x128xf32>
    %27 = arith.maximumf %25, %26 : vector<4x128xf32>
    %c0_12 = arith.constant 0 : index
    %c0_13 = arith.constant 0 : index
    %28 = vector.load %arg6[%c0_12, %c0_13] : memref<4x4xf32, #tpu.memory_space<vmem>>, vector<4x4xf32>
    %cst_14 = arith.constant dense<0.000000e+00> : vector<4x128xf32>
    %29 = tpu.matmul %28, %27, %cst_14 {dimension_numbers = #tpu.dot_dimension_numbers<[1], [0], [0], [1], [0, 0, 1, 1], [], []>} : vector<4x4xf32>, vector<4x128xf32>, vector<4x128xf32> -> vector<4x128xf32>
    %c0_15 = arith.constant 0 : index
    %c0_16 = arith.constant 0 : index
    %30 = vector.load %arg7[%c0_15, %c0_16] : memref<4x1xf32, #tpu.memory_space<vmem>>, vector<4x1xf32>
    %31 = vector.broadcast %30 : vector<4x1xf32> to vector<4x128xf32>
    %32 = arith.addf %29, %31 : vector<4x128xf32>
    %c0_17 = arith.constant 0 : index
    %c0_18 = arith.constant 0 : index
    %33 = vector.load %arg8[%c0_17, %c0_18] : memref<4x128xf32, #tpu.memory_space<vmem>>, vector<4x128xf32>
    tpu.vector_store %arg8[%c0_17, %c0_18], %32 {strides = array<i32>} : memref<4x128xf32, #tpu.memory_space<vmem>>, vector<4x128xf32>,
    return
  }
  func.func @transform_0(%arg0: i32) -> (i32, i32) {
    %c0_i32 = arith.constant 0 : i32
    %c0_i32_0 = arith.constant 0 : i32
    return %c0_i32, %arg0 : i32, i32
  }
  func.func @transform_1(%arg0: i32) -> (i32, i32) {
    %c0_i32 = arith.constant 0 : i32
    %c0_i32_0 = arith.constant 0 : i32
    %c0_i32_1 = arith.constant 0 : i32
    return %c0_i32, %c0_i32_0 : i32, i32
  }
  func.func @transform_2(%arg0: i32) -> (i32, i32) {
    %c0_i32 = arith.constant 0 : i32
    %c0_i32_0 = arith.constant 0 : i32
    %c0_i32_1 = arith.constant 0 : i32
    return %c0_i32, %c0_i32_0 : i32, i32
  }
  func.func @transform_3(%arg0: i32) -> (i32, i32) {
    %c0_i32 = arith.constant 0 : i32
    %c0_i32_0 = arith.constant 0 : i32
    %c0_i32_1 = arith.constant 0 : i32
    return %c0_i32, %c0_i32_0 : i32, i32
  }
  func.func @transform_4(%arg0: i32) -> (i32, i32) {
    %c0_i32 = arith.constant 0 : i32
    %c0_i32_0 = arith.constant 0 : i32
    %c0_i32_1 = arith.constant 0 : i32
    return %c0_i32, %c0_i32_0 : i32, i32
  }
  func.func @transform_5(%arg0: i32) -> (i32, i32) {
    %c0_i32 = arith.constant 0 : i32
    %c0_i32_0 = arith.constant 0 : i32
    %c0_i32_1 = arith.constant 0 : i32
    return %c0_i32, %c0_i32_0 : i32, i32
  }
  func.func @transform_6(%arg0: i32) -> (i32, i32) {
    %c0_i32 = arith.constant 0 : i32
    %c0_i32_0 = arith.constant 0 : i32
    %c0_i32_1 = arith.constant 0 : i32
    return %c0_i32, %c0_i32_0 : i32, i32
  }
  func.func @transform_7(%arg0: i32) -> (i32, i32) {
    %c0_i32 = arith.constant 0 : i32
    %c0_i32_0 = arith.constant 0 : i32
    return %c0_i32, %arg0 : i32, i32
  }
}

</mosaic_0001>

<bundles_post_ra>
// kernel: tpu_custom_call.1
= control target key start
LH: loop header
LB: loop body
LE: loop exit
PB: predicated region body
PF: predicated region fallthrough
CT: control target
= control target key end

     0   :  { %12 = vsyncpa [#allocation3], 0  ;;  %s897_s0 = inlined_call_operand.vmem [shape: s32[8,256], index: 0, kind: input, shape index: {}]   ;;  %s898_s1 = inlined_call_operand.hbm [shape: f32[8,24], index: 1, kind: input, shape index: {}]   ;;  %s899_s2 = inlined_call_operand.vmem [shape: f32[8,1], index: 2, kind: input, shape index: {}]   ;;  %s900_s3 = inlined_call_operand.vmem [shape: f32[4,8], index: 3, kind: input, shape index: {}]   ;;  %s901_s4 = inlined_call_operand.vmem [shape: f32[4,1], index: 4, kind: input, shape index: {}]   ;;  %s902_s5 = inlined_call_operand.hbm [shape: f32[4,4], index: 5, kind: input, shape index: {}]   ;;  %s903_s6 = inlined_call_operand.vmem [shape: f32[4,1], index: 6, kind: input, shape index: {}]   ;;  %s904_s7 = inlined_call_operand.hbm [shape: f32[4,256], index: 7, kind: output, shape index: {}]  }
   0x1   :  { %13 = vsyncpa [#allocation6], 0 }
   0x2   :  { %14 = vsyncpa [#allocation4], 0 }
   0x3   :  { %16 = vsyncpa [#allocation4 + $0x1], 0  ;;  %s775_s24 = smov 0   ;;  %s777_s25 = smov 0  }
   0x4   :  { %s779_s26 = smov 0   ;;  %s781_s27 = smov 0  }
   0x5 LB: > { %s796_s28 = sadd.s32 4294967295, %s729_s27   ;;  %s511_s29 = sadd.s32 4294967294, %s729_s27   ;;  %s729_s27 = sphi %s781_s27, %s911_s27   ;;  %s725_s26 = sphi %s779_s26, %s910_s26   ;;  %s721_s25 = sphi %s777_s25, %s909_s25   ;;  %s717_s24 = sphi %s775_s24, %s908_s24  }
   0x6   : > { %s800_s30 = sadd.s32 1, %s729_s27   ;;  %s181_s8 = sadd.s32 1, %s725_s26 }
   0x7   : > { %s178_s9 = ssub.s32 %s729_s27, %s800_s30  ;;  %p191_p0 = scmp.ne.s32.totalorder %s725_s26, %s721_s25 }
   0x8   : > { %p179_p1 = scmp.eq.s32.totalorder %s178_s9, 0  ;;  %p192_p2 = scmp.eq.s32.totalorder %s796_s28, 1 }
   0x9   : > { %p197_p3 = scmp.ne.s32.totalorder %s721_s25, %s717_s24  ;;  %p198_p4 = scmp.eq.s32.totalorder %s511_s29, 1 }
   0xa   : > { %s811_s10 = scalar_select %p179_p1, %s725_s26, %s181_s8  }
   0xb   : > { %p813_p5 = por %p192_p2, %p191_p0  ;;  %p817_p6 = por %p198_p4, %p197_p3 }
   0xc   : > { %p512_p7 = scmp.ge.s32.totalorder %s729_s27, 1  ;;  %p205_p8 = scmp.lt.s32.totalorder %s729_s27, 3 }
   0xd   : > { %p556_p9 = scmp.eq.s32.totalorder %s796_s28, 0  ;;  %s217_s16 = sshll.u32 %s898_s1, 4  ;;  %s218_s16 = int_to_ptr.hbm [resolvable:$true] %s217_s16 }
   0xe   : > { %p824_p10 = pnand %p512_p7, %p205_p8  ;;  %s731_s17 = smov [#allocation2]  }
   0xf   : > { %s219_s18 = sshll.u32 %s731_s17, 4  ;;  %s238_s21 = sshll.u32 %s902_s5, 4  ;;  %s220_s18 = int_to_ptr.vmem [resolvable:$true] %s219_s18  ;;  %s239_s21 = int_to_ptr.hbm [resolvable:$true] %s238_s21 }
  0x10   : > { %p545_p11 = pneg %p824_p10  ;;  %s732_s22 = smov [#allocation5]  }
  0x11   : > { %s240_s23 = sshll.u32 %s732_s22, 4  ;;  %263 = sbr.rel (%p824_p10) target bundleno = 437 (0x1b5), region = 48  ;;  %s241_s23 = int_to_ptr.vmem [resolvable:$true] %s240_s23 }
  0x12   : > { %p546_p12 = pnand %p556_p9, %p545_p11 }
  0x14   : > { %548 = dma.hbm_to_vmem [thread:$0]  (!%p546_p12), %s218_s16, 128, %s220_s18, [#allocation3]  }
  0x15   : > { %551 = dma.hbm_to_vmem [thread:$0]  (!%p546_p12), %s239_s21, 64, %s241_s23, [#allocation6]  }
  0x16   : > { %704 = dma.done.wait (%p556_p9), [#allocation3], 128  }
  0x17   : > { %706 = vsyncadd (%p556_p9), [#allocation3], 4294967168 }
  0x18   : > { %708 = dma.done.wait (%p556_p9), [#allocation6], 64  }
  0x19   : > { %710 = vsyncadd (%p556_p9), [#allocation6], 4294967232  ;;  %p300_p13 = scmp.lt.s32.totalorder %s796_s28, 1  ;;  %v733_v0 = vmov 0   ;;  %v315_v2 = vld [vmem:[%s899_s2] sm:$0xff]  ;;  %v734_v3 = vmov 1.0  }
  0x1a   : > { %597 = vset.pattern.permute.xlu0 %v733_v0  ;;  %598 = vset.pattern.permute.xlu1 %v733_v0  ;;  %v314_v4 = vld [vmem:[#allocation2] sm:$0xff]  ;;  %vm321_vm3 = vcmask 195584   ;;  %vm353_vm4 = vcmask 64512   ;;  %vm389_vm5 = vcmask 1043456   ;;  %v378_v16 = vld [vmem:[#allocation5] sm:$0xf] }
  0x1b   : > { %s301_s29 = scalar_select %p300_p13, %s796_s28, 1  ;;  %318 = vperm.xlu0 %597, %v315_v2   ;;  %v347_v5 = vld [vmem:[%s901_s4] sm:$0xf]  ;;  %vm385_vm6 = vcmask 31744  }
  0x1c   : > { %v346_v10 = vld [vmem:[%s900_s3] sm:$0xf]  ;;  %s297_s23 = sand.u32 1, %s721_s25   ;;  %s679_s22 = scalar_lea.hbm %s904_s7, 8 }
  0x1d   : > { %s520_s8 = sshll.u32 %s301_s29, 3  ;;  %v379_v11 = vld [vmem:[%s903_s6] sm:$0xf]  ;;  %s519_s29 = sshll.u32 %s297_s23, 2 }
  0x1e   : > { %s303_s14 = scalar_lea.vmem %s897_s0, %s520_s8  ;;  %382 = vperm.xlu1 %598, %v379_v11   ;;  %s532_s8 = sshll.u32 %s796_s28, 2 }
  0x1f   : > { %v304_v1 = vld [vmem:[%s303_s14] sm:$0xff]  ;;  %s425_s14 = scalar_lea.hbm %s904_s7, %s532_s8  ;;  %s299_s15 = scalar_lea.vmem [#allocation7], %s519_s29 }
  0x20   : > { %vm311_vm0 = vcmp.eq.s32.totalorder %v304_v1, 2  ;;  %vm308_vm1 = vcmp.eq.s32.totalorder %v304_v1, 1  ;;  %vm305_vm2 = vcmp.eq.s32.totalorder %v304_v1, 0  ;;  %s427_s16 = sshll.u32 %s299_s15, 4  ;;  %s429_s17 = sshll.u32 %s425_s14, 4  ;;  %s428_s16 = int_to_ptr.vmem [resolvable:$true] %s427_s16  ;;  %s430_s17 = int_to_ptr.hbm [resolvable:$true] %s429_s17 }
  0x21   : > { %524 = vmatpush.msk.msra.mxu0 %vm311_vm0, %v734_v3  ;;  %s415_s18 = scalar_lea.sflag [#allocation4], %s297_s23  ;;  %s673_s19 = sshra.s32 %s430_s17, 4  ;;  %s674_s19 = int_to_ptr.hbm [resolvable:$true] %s673_s19 }
  0x22   : > { %s675_s20 = scalar_lea.hbm %s674_s19, 4  ;;  %p680_p3 = scmp.lt.s32.totalorder %s674_s19, %s904_s7 }
  0x23   : > { %525 = vmatpush.msk.msra.mxu0 %vm308_vm1, %v734_v3  ;;  %350 = vperm.xlu0 %597, %v347_v5   ;;  %p676_p0 = scmp.ne.s32.totalorder %s674_s19, %s675_s20  ;;  %p681_p4 = scmp.lt.s32.totalorder %s679_s22, %s675_s20 }
  0x25   : > { %526 = vmatpush.msk.msra.mxu0 %vm305_vm2, %v734_v3  ;;  %p677_p1 = pnand %p676_p0, %p813_p5  ;;  %p682_p7 = por %p681_p4, %p680_p3 }
  0x26   : > { %527 = vmatmul.msk.f32.vlgmr.msra.gmra.mxu0 %vm321_vm3, %v314_v4 }
  0x27   : > { %p678_p2 = pneg %p677_p1 }
  0x29   : > { %p683_p8 = pnand %p682_p7, %p678_p2 }
  0x8d   : > { %v319_v6 = vpop.permute.xlu0 %318 }
  0x90   : > { %v383_v17 = vpop.permute.xlu1 %382 }
  0x95   : > { %v351_v12 = vpop.permute.xlu0 %350 }
  0xa3   : > { %v342_v7 = vpop.f32.mrf.mxu0 }
  0xa4   : > { %v343_v8 = vadd.f32 %v342_v7, %v319_v6 }
  0xa6   : > { %v345_v9 = vmax.f32 %v343_v8, 0.0 }
  0xa8   : > { %372 = vmatpush.msra.mxu1 %v345_v9 }
  0xa9   : > { %528 = vmatmul.msk.f32.vlgmr.msra.gmra.mxu1 %vm353_vm4, %v346_v10 }
 0x126   : > { %v374_v13 = vpop.f32.mrf.mxu1 }
 0x127   : > { %v375_v14 = vadd.f32 %v374_v13, %v351_v12 }
 0x129   : > { %v377_v15 = vmax.f32 %v375_v14, 0.0 }
 0x12b   : > { %529 = vmatpush.msk.msra.mxu2 %vm389_vm5, %v377_v15 }
 0x12c   : > { %530 = vmatmul.msk.f32.vlgmr.msra.gmra.mxu2 %vm385_vm6, %v378_v16 }
 0x1af   : > { %v410_v18 = vpop.f32.mrf.mxu2 }
 0x1b0   : > { %v411_v19 = vadd.f32 %v410_v18, %v383_v17 }
 0x1b2   : > { %413 = vst [vmem:[%s299_s15] sm:$0xf] %v411_v19 }
 0x1b3   : > { %686 = shalt.err (!%p683_p8)
}
 0x1b4   : > { %543 = dma.vmem_to_hbm [thread:$0]  (%p813_p5), %s428_s16, 64, %s430_s17, %s415_s18  }
 0x1b5 PF: > { %p560_p9 = scmp.ge.s32.totalorder %s729_s27, 2  ;;  %s441_s23 = sand.u32 1, %s717_s24  }
 0x1b6   : > { %s442_s9 = scalar_lea.sflag [#allocation4], %s441_s23 }
 0x1b7   : > { %p553_p10 = pnand %p560_p9, %p817_p6 }
 0x1b9   : > { %p554_p11 = pneg %p553_p10 }
 0x1bb   : > { %712 = dma.done.wait (%p554_p11), %s442_s9, 64  }
 0x1bc   : > { %714 = vsyncadd (%p554_p11), %s442_s9, 4294967232  ;;  %p19_p12 = scmp.ge.s32.totalorder %s800_s30, 4   ;;  %s908_s24 = smov %s721_s25 }
 0x1bd   : > { %s909_s25 = smov %s725_s26  ;;  %s910_s26 = smov %s811_s10 }
 0x1be   : > { %s911_s27 = smov %s800_s30  ;;  %21 = sbr.rel (!%p19_p12) target bundleno = 5 (0x5), region = 92 }
 0x1c3   :  { %448 = vsyncpa [#allocation3], 1 }
 0x1c4   :  { %450 = vsyncpa [#allocation3 + $0x1], 1 }
 0x1c5   :  { %451 = vsyncpa [#allocation6], 1 }
 0x1c6   :  { %452 = vsyncpa [#allocation4], 1 }
 0x1c7   :  { %454 = vsyncpa [#allocation4 + $0x1], 1 }

</bundles_post_ra>
